<compile_context>
chip_gen: v6e
topology: v6e:2x2x1
jax: 0.10.0
libtpu: 0.0.40
codegen_flags: <defaults>
</compile_context>

<pallas_src>
import math
from functools import partial

import jax
import jax.numpy as jnp
from jax import lax
from jax.experimental import pallas as pl
from jax.experimental.pallas import tpu as pltpu


def dcl_kernel(z_ref, out_ref, *, inv_temp, scale):
    z = z_ref[...].astype(jnp.float32)                     # (bb, T, D)
    bb, T, _ = z.shape

    # F.normalize(z, p=2, dim=-1) with eps=1e-12 — rsqrt goes to the EUP slot.
    ssq = jnp.sum(z * z, axis=-1, keepdims=True)
    zn = z * lax.rsqrt(jnp.maximum(ssq, 1e-24))            # (bb, T, D)

    if T <= 16:
        # VPU path: contraction (D) and T are far below one MXU tile, so a
        # batched matmul would be >99% padding. Unroll over s instead.
        t_idx = lax.broadcasted_iota(jnp.int32, (bb, T), 1)
        off_sum = jnp.zeros((bb, T), jnp.float32)
        pos_log = jnp.zeros((bb, T), jnp.float32)
        for s in range(T):
            # log(sim[:, :, s]) = <zn[:, t], zn[:, s]> / temp          (bb, T)
            dot_s = jnp.sum(zn * zn[:, s:s + 1, :], axis=-1) * inv_temp
            if s == 0:
                pos_log = dot_s                            # log(pos_sim) rows
            # masked_select(~eye): drop the t == s entry before summing.
            off_sum = off_sum + jnp.where(t_idx == s, 0.0, jnp.exp(dot_s))
    else:
        # Larger T: batched Gram on the MXU, diagonal masked pre-sum.
        gram = jnp.einsum("btd,bsd->bts", zn, zn,
                          preferred_element_type=jnp.float32) * inv_temp
        t_i = lax.broadcasted_iota(jnp.int32, (T, T), 0)
        s_i = lax.broadcasted_iota(jnp.int32, (T, T), 1)
        off = jnp.where((t_i == s_i)[None], 0.0, jnp.exp(gram))
        off_sum = jnp.sum(off, axis=-1)                    # (bb, T)
        pos_log = gram[:, :, 0]                            # (bb, T)

    trans_log = jnp.log(off_sum[:, 1:])                    # (bb, T-1)
    loss = jnp.sum((trans_log - pos_log[:, 1:]) * scale, axis=-1)  # (bb,)
    out_ref[...] = loss[None, :]                           # lane-dense (1, bb)


def _pick_block_batch(B, T, D):
    """Batch tile: keep the double-buffered input tile ~<= 8 MiB so the whole
    working set stays well inside v7x's 64 MiB physical / 32 MiB scoped VMEM
    (and trivially inside v5e/v6e's 128 MiB)."""
    budget = 8 * 1024 * 1024
    per_row = T * D * 4 * 2                                # f32 input, 2x buffered
    max_bb = max(1, budget // per_row)
    if B <= max_bb:
        return B                                           # single/whole blocks OK
    # Need lane-dense output blocks: bb must be a multiple of 128 (or == B).
    cand = max_bb - (max_bb % 128)
    while cand >= 128:
        if B % cand == 0:
            return cand
        cand -= 128
    return B  # TODO(synk): pad/mask the batch axis for awkward large B.


def dcl_loss(z, temperature=0.1, block_batch=None):
    B, T, D = z.shape
    K = T - 1
    scale = 1.0 / abs(K * math.log(1.0 / K))
    bb = _pick_block_batch(B, T, D) if block_batch is None else block_batch
    assert B % bb == 0

    kernel = partial(dcl_kernel, inv_temp=float(1.0 / temperature),
                     scale=float(scale))
    out = pl.pallas_call(
        kernel,
        out_shape=jax.ShapeDtypeStruct((1, B), jnp.float32),
        grid=(B // bb,),
        in_specs=[pl.BlockSpec((bb, T, D), lambda i: (i, 0, 0))],
        out_specs=pl.BlockSpec((1, bb), lambda i: (0, i)),
        compiler_params=pltpu.CompilerParams(
            dimension_semantics=("parallel",)),
    )(z)
    return out[0]


def dcl_ref(z, temperature=0.1):
    """Pure-JAX reference mirroring the PyTorch forward (f32-exact matmul)."""
    zn = z / jnp.maximum(jnp.linalg.norm(z, axis=-1, keepdims=True), 1e-12)
    B, T, D = z.shape
    sim = jnp.exp(jnp.einsum("btd,bsd->bts", zn, zn / temperature,
                             precision=lax.Precision.HIGHEST))
    mask = 1.0 - jnp.eye(T, dtype=sim.dtype)[None]
    trans = jnp.sum(sim * mask, axis=-1)[:, 1:]
    pos = jnp.exp(jnp.sum(zn[:, 1:] * zn[:, :1], axis=-1) / temperature)
    K = T - 1
    scale = 1.0 / abs(K * math.log(1.0 / K))
    return jnp.sum((jnp.log(trans) - jnp.log(pos)) * scale, axis=1)


if __name__ == "__main__":
    key = jax.random.PRNGKey(0)
    B, T, D = 2, 8, 32  # batch, num_trans, z_dim (K = T - 1 = 7)
    z = jax.random.normal(key, (B, T, D), dtype=jnp.float32)

    out = jax.block_until_ready(dcl_loss(z, temperature=0.1))
    ref = jax.block_until_ready(dcl_ref(z, temperature=0.1))

    assert out.shape == (B,)
    assert jnp.allclose(out, ref, rtol=1e-4, atol=1e-4), (out, ref)
    print("KERNEL_OK")
</pallas_src>

<mosaic_0001>
module attributes {stable_mosaic.version = 11 : i64} {
  func.func @dcl_kernel(%arg0: i32, %arg1: memref<2x8x32xf32, #tpu.memory_space<vmem>>, %arg2: memref<1x2xf32, #tpu.memory_space<vmem>>) attributes {dimension_semantics = [#tpu.dimension_semantics<parallel>], iteration_bounds = array<i64: 1>, scalar_prefetch = 0 : i64, scratch_operands = 0 : i64, tpu.core_type = #tpu.core_type<tc>, window_params = [{transform_indices = @transform_0, window_bounds = array<i64: 2, 8, 32>}, {transform_indices = @transform_1, window_bounds = array<i64: 1, 2>}]} {
    %c0 = arith.constant 0 : index
    %c0_0 = arith.constant 0 : index
    %c0_1 = arith.constant 0 : index
    %0 = vector.load %arg1[%c0, %c0_0, %c0_1] : memref<2x8x32xf32, #tpu.memory_space<vmem>>, vector<2x8x32xf32>
    %1 = arith.mulf %0, %0 : vector<2x8x32xf32>
    %cst = arith.constant dense<0.000000e+00> : vector<2x8xf32>
    %2 = vector.multi_reduction <add>, %1, %cst [2] : vector<2x8x32xf32> to vector<2x8xf32>
    %3 = vector.shape_cast %2 : vector<2x8xf32> to vector<2x8x1xf32>
    %cst_2 = arith.constant 1.000000e-24 : f32
    %4 = vector.broadcast %cst_2 : f32 to vector<2x8x1xf32>
    %5 = arith.maximumf %3, %4 : vector<2x8x1xf32>
    %6 = math.rsqrt %5 : vector<2x8x1xf32>
    %7 = vector.broadcast %6 : vector<2x8x1xf32> to vector<2x8x32xf32>
    %8 = arith.mulf %0, %7 : vector<2x8x32xf32>
    %9 = tpu.iota {dimensions = array<i32: 1>} : vector<2x8xi32>
    %cst_3 = arith.constant 0.000000e+00 : f32
    %10 = vector.broadcast %cst_3 : f32 to vector<2x8xf32>
    %11 = vector.extract_strided_slice %8 {offsets = [0, 0, 0], sizes = [2, 1, 32], strides = [1, 1, 1]} : vector<2x8x32xf32> to vector<2x1x32xf32>
    %12 = vector.broadcast %11 : vector<2x1x32xf32> to vector<2x8x32xf32>
    %13 = arith.mulf %8, %12 : vector<2x8x32xf32>
    %cst_4 = arith.constant dense<0.000000e+00> : vector<2x8xf32>
    %14 = vector.multi_reduction <add>, %13, %cst_4 [2] : vector<2x8x32xf32> to vector<2x8xf32>
    %cst_5 = arith.constant 1.000000e+01 : f32
    %15 = vector.broadcast %cst_5 : f32 to vector<2x8xf32>
    %16 = arith.mulf %14, %15 : vector<2x8xf32>
    %c0_i32 = arith.constant 0 : i32
    %17 = vector.broadcast %c0_i32 : i32 to vector<2x8xi32>
    %18 = arith.cmpi eq, %9, %17 : vector<2x8xi32>
    %19 = math.exp %16 : vector<2x8xf32>
    %cst_6 = arith.constant 0.000000e+00 : f32
    %20 = vector.broadcast %cst_6 : f32 to vector<2x8xf32>
    %21 = arith.select %18, %20, %19 : vector<2x8xi1>, vector<2x8xf32>
    %22 = arith.addf %10, %21 : vector<2x8xf32>
    %23 = vector.extract_strided_slice %8 {offsets = [0, 1, 0], sizes = [2, 1, 32], strides = [1, 1, 1]} : vector<2x8x32xf32> to vector<2x1x32xf32>
    %24 = vector.broadcast %23 : vector<2x1x32xf32> to vector<2x8x32xf32>
    %25 = arith.mulf %8, %24 : vector<2x8x32xf32>
    %cst_7 = arith.constant dense<0.000000e+00> : vector<2x8xf32>
    %26 = vector.multi_reduction <add>, %25, %cst_7 [2] : vector<2x8x32xf32> to vector<2x8xf32>
    %cst_8 = arith.constant 1.000000e+01 : f32
    %27 = vector.broadcast %cst_8 : f32 to vector<2x8xf32>
    %28 = arith.mulf %26, %27 : vector<2x8xf32>
    %c1_i32 = arith.constant 1 : i32
    %29 = vector.broadcast %c1_i32 : i32 to vector<2x8xi32>
    %30 = arith.cmpi eq, %9, %29 : vector<2x8xi32>
    %31 = math.exp %28 : vector<2x8xf32>
    %cst_9 = arith.constant 0.000000e+00 : f32
    %32 = vector.broadcast %cst_9 : f32 to vector<2x8xf32>
    %33 = arith.select %30, %32, %31 : vector<2x8xi1>, vector<2x8xf32>
    %34 = arith.addf %22, %33 : vector<2x8xf32>
    %35 = vector.extract_strided_slice %8 {offsets = [0, 2, 0], sizes = [2, 1, 32], strides = [1, 1, 1]} : vector<2x8x32xf32> to vector<2x1x32xf32>
    %36 = vector.broadcast %35 : vector<2x1x32xf32> to vector<2x8x32xf32>
    %37 = arith.mulf %8, %36 : vector<2x8x32xf32>
    %cst_10 = arith.constant dense<0.000000e+00> : vector<2x8xf32>
    %38 = vector.multi_reduction <add>, %37, %cst_10 [2] : vector<2x8x32xf32> to vector<2x8xf32>
    %cst_11 = arith.constant 1.000000e+01 : f32
    %39 = vector.broadcast %cst_11 : f32 to vector<2x8xf32>
    %40 = arith.mulf %38, %39 : vector<2x8xf32>
    %c2_i32 = arith.constant 2 : i32
    %41 = vector.broadcast %c2_i32 : i32 to vector<2x8xi32>
    %42 = arith.cmpi eq, %9, %41 : vector<2x8xi32>
    %43 = math.exp %40 : vector<2x8xf32>
    %cst_12 = arith.constant 0.000000e+00 : f32
    %44 = vector.broadcast %cst_12 : f32 to vector<2x8xf32>
    %45 = arith.select %42, %44, %43 : vector<2x8xi1>, vector<2x8xf32>
    %46 = arith.addf %34, %45 : vector<2x8xf32>
    %47 = vector.extract_strided_slice %8 {offsets = [0, 3, 0], sizes = [2, 1, 32], strides = [1, 1, 1]} : vector<2x8x32xf32> to vector<2x1x32xf32>
    %48 = vector.broadcast %47 : vector<2x1x32xf32> to vector<2x8x32xf32>
    %49 = arith.mulf %8, %48 : vector<2x8x32xf32>
    %cst_13 = arith.constant dense<0.000000e+00> : vector<2x8xf32>
    %50 = vector.multi_reduction <add>, %49, %cst_13 [2] : vector<2x8x32xf32> to vector<2x8xf32>
    %cst_14 = arith.constant 1.000000e+01 : f32
    %51 = vector.broadcast %cst_14 : f32 to vector<2x8xf32>
    %52 = arith.mulf %50, %51 : vector<2x8xf32>
    %c3_i32 = arith.constant 3 : i32
    %53 = vector.broadcast %c3_i32 : i32 to vector<2x8xi32>
    %54 = arith.cmpi eq, %9, %53 : vector<2x8xi32>
    %55 = math.exp %52 : vector<2x8xf32>
    %cst_15 = arith.constant 0.000000e+00 : f32
    %56 = vector.broadcast %cst_15 : f32 to vector<2x8xf32>
    %57 = arith.select %54, %56, %55 : vector<2x8xi1>, vector<2x8xf32>
    %58 = arith.addf %46, %57 : vector<2x8xf32>
    %59 = vector.extract_strided_slice %8 {offsets = [0, 4, 0], sizes = [2, 1, 32], strides = [1, 1, 1]} : vector<2x8x32xf32> to vector<2x1x32xf32>
    %60 = vector.broadcast %59 : vector<2x1x32xf32> to vector<2x8x32xf32>
    %61 = arith.mulf %8, %60 : vector<2x8x32xf32>
    %cst_16 = arith.constant dense<0.000000e+00> : vector<2x8xf32>
    %62 = vector.multi_reduction <add>, %61, %cst_16 [2] : vector<2x8x32xf32> to vector<2x8xf32>
    %cst_17 = arith.constant 1.000000e+01 : f32
    %63 = vector.broadcast %cst_17 : f32 to vector<2x8xf32>
    %64 = arith.mulf %62, %63 : vector<2x8xf32>
    %c4_i32 = arith.constant 4 : i32
    %65 = vector.broadcast %c4_i32 : i32 to vector<2x8xi32>
    %66 = arith.cmpi eq, %9, %65 : vector<2x8xi32>
    %67 = math.exp %64 : vector<2x8xf32>
    %cst_18 = arith.constant 0.000000e+00 : f32
    %68 = vector.broadcast %cst_18 : f32 to vector<2x8xf32>
    %69 = arith.select %66, %68, %67 : vector<2x8xi1>, vector<2x8xf32>
    %70 = arith.addf %58, %69 : vector<2x8xf32>
    %71 = vector.extract_strided_slice %8 {offsets = [0, 5, 0], sizes = [2, 1, 32], strides = [1, 1, 1]} : vector<2x8x32xf32> to vector<2x1x32xf32>
    %72 = vector.broadcast %71 : vector<2x1x32xf32> to vector<2x8x32xf32>
    %73 = arith.mulf %8, %72 : vector<2x8x32xf32>
    %cst_19 = arith.constant dense<0.000000e+00> : vector<2x8xf32>
    %74 = vector.multi_reduction <add>, %73, %cst_19 [2] : vector<2x8x32xf32> to vector<2x8xf32>
    %cst_20 = arith.constant 1.000000e+01 : f32
    %75 = vector.broadcast %cst_20 : f32 to vector<2x8xf32>
    %76 = arith.mulf %74, %75 : vector<2x8xf32>
    %c5_i32 = arith.constant 5 : i32
    %77 = vector.broadcast %c5_i32 : i32 to vector<2x8xi32>
    %78 = arith.cmpi eq, %9, %77 : vector<2x8xi32>
    %79 = math.exp %76 : vector<2x8xf32>
    %cst_21 = arith.constant 0.000000e+00 : f32
    %80 = vector.broadcast %cst_21 : f32 to vector<2x8xf32>
    %81 = arith.select %78, %80, %79 : vector<2x8xi1>, vector<2x8xf32>
    %82 = arith.addf %70, %81 : vector<2x8xf32>
    %83 = vector.extract_strided_slice %8 {offsets = [0, 6, 0], sizes = [2, 1, 32], strides = [1, 1, 1]} : vector<2x8x32xf32> to vector<2x1x32xf32>
    %84 = vector.broadcast %83 : vector<2x1x32xf32> to vector<2x8x32xf32>
    %85 = arith.mulf %8, %84 : vector<2x8x32xf32>
    %cst_22 = arith.constant dense<0.000000e+00> : vector<2x8xf32>
    %86 = vector.multi_reduction <add>, %85, %cst_22 [2] : vector<2x8x32xf32> to vector<2x8xf32>
    %cst_23 = arith.constant 1.000000e+01 : f32
    %87 = vector.broadcast %cst_23 : f32 to vector<2x8xf32>
    %88 = arith.mulf %86, %87 : vector<2x8xf32>
    %c6_i32 = arith.constant 6 : i32
    %89 = vector.broadcast %c6_i32 : i32 to vector<2x8xi32>
    %90 = arith.cmpi eq, %9, %89 : vector<2x8xi32>
    %91 = math.exp %88 : vector<2x8xf32>
    %cst_24 = arith.constant 0.000000e+00 : f32
    %92 = vector.broadcast %cst_24 : f32 to vector<2x8xf32>
    %93 = arith.select %90, %92, %91 : vector<2x8xi1>, vector<2x8xf32>
    %94 = arith.addf %82, %93 : vector<2x8xf32>
    %95 = vector.extract_strided_slice %8 {offsets = [0, 7, 0], sizes = [2, 1, 32], strides = [1, 1, 1]} : vector<2x8x32xf32> to vector<2x1x32xf32>
    %96 = vector.broadcast %95 : vector<2x1x32xf32> to vector<2x8x32xf32>
    %97 = arith.mulf %8, %96 : vector<2x8x32xf32>
    %cst_25 = arith.constant dense<0.000000e+00> : vector<2x8xf32>
    %98 = vector.multi_reduction <add>, %97, %cst_25 [2] : vector<2x8x32xf32> to vector<2x8xf32>
    %cst_26 = arith.constant 1.000000e+01 : f32
    %99 = vector.broadcast %cst_26 : f32 to vector<2x8xf32>
    %100 = arith.mulf %98, %99 : vector<2x8xf32>
    %c7_i32 = arith.constant 7 : i32
    %101 = vector.broadcast %c7_i32 : i32 to vector<2x8xi32>
    %102 = arith.cmpi eq, %9, %101 : vector<2x8xi32>
    %103 = math.exp %100 : vector<2x8xf32>
    %cst_27 = arith.constant 0.000000e+00 : f32
    %104 = vector.broadcast %cst_27 : f32 to vector<2x8xf32>
    %105 = arith.select %102, %104, %103 : vector<2x8xi1>, vector<2x8xf32>
    %106 = arith.addf %94, %105 : vector<2x8xf32>
    %107 = vector.extract_strided_slice %106 {offsets = [0, 1], sizes = [2, 7], strides = [1, 1]} : vector<2x8xf32> to vector<2x7xf32>
    %108 = math.log %107 : vector<2x7xf32>
    %109 = vector.extract_strided_slice %16 {offsets = [0, 1], sizes = [2, 7], strides = [1, 1]} : vector<2x8xf32> to vector<2x7xf32>
    %110 = arith.subf %108, %109 : vector<2x7xf32>
    %cst_28 = arith.constant 0.07341405 : f32
    %111 = vector.broadcast %cst_28 : f32 to vector<2x7xf32>
    %112 = arith.mulf %110, %111 : vector<2x7xf32>
    %cst_29 = arith.constant dense<0.000000e+00> : vector<2xf32>
    %113 = vector.multi_reduction <add>, %112, %cst_29 [1] : vector<2x7xf32> to vector<2xf32>
    %114 = vector.shape_cast %113 : vector<2xf32> to vector<1x2xf32>
    %c0_30 = arith.constant 0 : index
    %c0_31 = arith.constant 0 : index
    %115 = vector.load %arg2[%c0_30, %c0_31] : memref<1x2xf32, #tpu.memory_space<vmem>>, vector<1x2xf32>
    tpu.vector_store %arg2[%c0_30, %c0_31], %114 {strides = array<i32>} : memref<1x2xf32, #tpu.memory_space<vmem>>, vector<1x2xf32>,
    return
  }
  func.func @transform_0(%arg0: i32) -> (i32, i32, i32) {
    %c0_i32 = arith.constant 0 : i32
    %c0_i32_0 = arith.constant 0 : i32
    %c0_i32_1 = arith.constant 0 : i32
    return %arg0, %c0_i32, %c0_i32_0 : i32, i32, i32
  }
  func.func @transform_1(%arg0: i32) -> (i32, i32) {
    %c0_i32 = arith.constant 0 : i32
    %c0_i32_0 = arith.constant 0 : i32
    return %c0_i32, %arg0 : i32, i32
  }
}

</mosaic_0001>

<bundles_post_ra>
// kernel: tpu_custom_call.1
= control target key start
LH: loop header
LB: loop body
LE: loop exit
PB: predicated region body
PF: predicated region fallthrough
CT: control target
= control target key end

     0   :  { %6 = vsyncpa [#allocation3], 0  ;;  %s572_s0 = inlined_call_operand.hbm [shape: f32[2,8,32], index: 0, kind: input, shape index: {}]   ;;  %s573_s1 = inlined_call_operand.hbm [shape: f32[1,2], index: 1, kind: output, shape index: {}]  }
   0x1   :  { %7 = vsyncpa [#allocation4], 0  ;;  %s473_s6 = smov [#allocation2]  }
   0x2   :  { %s13_s7 = sshll.u32 %s473_s6, 4  ;;  %s14_s7 = int_to_ptr.vmem [resolvable:$true] %s13_s7 }
   0x3   :  { %s437_s8 = scalar_lea.vmem %s14_s7, 256  ;;  %p442_p1 = scmp.lt.s32.totalorder %s14_s7, %s14_s7 }
   0x4   :  { %p438_p0 = scmp.ne.s32.totalorder %s14_s7, %s437_s8  ;;  %p443_p2 = scmp.lt.s32.totalorder %s437_s8, %s437_s8 }
   0x6   :  { %p444_p3 = por %p443_p2, %p442_p1 }
   0x8   :  { %p445_p4 = pnand %p444_p3, %p438_p0 }
   0xa   :  { %448 = shalt.err (!%p445_p4)
}
   0xb   :  { %s474_s9 = smov 128   ;;  %s475_s10 = smov 8  }
   0xc   :  { %19 = dma.hbm_to_vmem [thread:$0]  %s572_s0, 256, %s14_s7, [#allocation3], %s474_s9, %s474_s9, %s475_s10  }
   0xd   :  { %469 = dma.done.wait [#allocation3], 256  }
   0xe   :  { %470 = vsyncadd [#allocation3], 4294967040  ;;  %v23_v0 = vld [vmem:[#allocation2] sm:$0xff]  ;;  %vm27_vm0 = vcmask 261120   ;;  %v24_v1 = vld [vmem:[#allocation2 + $0x8] sm:$0xff]  ;;  %v40_v6 = vlaneseq  ;;  %vm75_vm1 = vcmask 1041409  }
   0xf   :  { %v25_v2 = vmul.f32 %v23_v0, %v23_v0  ;;  %v26_v3 = vmul.f32 %v24_v1, %v24_v1  ;;  %s476_s0 = smov 127   ;;  %vm359_vm10 = vcmask 50176   ;;  %s477_s13 = smov [#allocation5]   ;;  %vm369_vm11 = vcmask 8192  }
  0x10   :  { %v493_v7 = vand.u32 127, %v40_v6  ;;  %v495_v8 = vshrl.u32 %v40_v6, 7  ;;  %s377_s14 = sshll.u32 %s477_s13, 4  ;;  %s378_s14 = int_to_ptr.vmem [resolvable:$true] %s377_s14 }
  0x11   :  { %v28_v4 = vsel %vm27_vm0, %v25_v2, 0.0  ;;  %v31_v5 = vsel %vm27_vm0, %v26_v3, 0.0  ;;  %s449_s15 = scalar_lea.vmem %s378_s14, 16  ;;  %s453_s16 = scalar_lea.vmem %s378_s14, 32 }
  0x12   :  { %29 = vadd.xlane.f32.xlu0 %v28_v4  ;;  %v499_v9 = vsub.s32 %v493_v7, %v495_v8  ;;  %v82_v14 = vsub.s32 1, %v495_v8  ;;  %v44_v15 = vsub.s32 0, %v495_v8  ;;  %v119_v16 = vsub.s32 2, %v495_v8  ;;  %p450_p5 = scmp.ne.s32.totalorder %s378_s14, %s449_s15  ;;  %p454_p6 = scmp.lt.s32.totalorder %s378_s14, %s378_s14 }
  0x13   :  { %v156_v19 = vsub.s32 3, %v495_v8  ;;  %v193_v28 = vsub.s32 4, %v495_v8  ;;  %v230_v37 = vsub.s32 5, %v495_v8  ;;  %v267_v44 = vsub.s32 6, %v495_v8  ;;  %p455_p7 = scmp.lt.s32.totalorder %s453_s16, %s449_s15 }
  0x14   :  { %v304_v51 = vsub.s32 7, %v495_v8  ;;  %vm98_vm2 = vcmp.eq.s32.totalorder %v493_v7, 1  ;;  %vm60_vm3 = vcmp.eq.s32.totalorder %v493_v7, 0  ;;  %vm135_vm4 = vcmp.eq.s32.totalorder %v493_v7, 2 }
  0x15   :  { %vm172_vm5 = vcmp.eq.s32.totalorder %v493_v7, 3  ;;  %vm209_vm6 = vcmp.eq.s32.totalorder %v493_v7, 4  ;;  %vm246_vm7 = vcmp.eq.s32.totalorder %v493_v7, 5  ;;  %vm283_vm8 = vcmp.eq.s32.totalorder %v493_v7, 6  ;;  %p456_p8 = por %p455_p7, %p454_p6 }
  0x16   :  { %32 = vadd.xlane.f32.xlu0 %v31_v5  ;;  %vm320_vm9 = vcmp.eq.s32.totalorder %v493_v7, 7 }
  0x17   :  { %p457_p9 = pnand %p456_p8, %p450_p5 }
  0x9b   :  { %v30_v10 = vpop.xlane.xlu0 %29 }
  0x9c   :  { %v34_v11 = vmax.f32 %v30_v10, 1e-24 }
  0x9e   :  { %391 = vrsqrt.f32 %v34_v11 }
  0x9f   :  { %v33_v12 = vpop.xlane.xlu0 %32 }
  0xa0   :  { %v35_v13 = vmax.f32 %v33_v12, 1e-24 }
  0xa2   :  { %393 = vrsqrt.f32 %v35_v13 }
  0xab   :  { %v392_v17 = vpop.eup %391 }
  0xac   :  { %v38_v18 = vmul.f32 %v392_v17, %v23_v0 }
  0xae   :  { %v83_v20 = vrot.slane %v38_v18, %v82_v14  ;;  %v45_v21 = vrot.slane %v38_v18, %v44_v15  ;;  %v120_v22 = vrot.slane %v38_v18, %v119_v16  ;;  %v157_v27 = vrot.slane %v38_v18, %v156_v19 }
  0xaf   :  { %v394_v23 = vpop.eup %393  ;;  %v194_v36 = vrot.slane %v38_v18, %v193_v28  ;;  %v231_v43 = vrot.slane %v38_v18, %v230_v37  ;;  %v268_v50 = vrot.slane %v38_v18, %v267_v44  ;;  %v305_v57 = vrot.slane %v38_v18, %v304_v51 }
  0xb0   :  { %v39_v24 = vmul.f32 %v394_v23, %v24_v1  ;;  %v88_v25 = vmul.f32 %v83_v20, %v38_v18  ;;  %v50_v26 = vmul.f32 %v45_v21, %v38_v18  ;;  %v125_v31 = vmul.f32 %v120_v22, %v38_v18 }
  0xb1   :  { %v162_v35 = vmul.f32 %v157_v27, %v38_v18  ;;  %v199_v42 = vmul.f32 %v194_v36, %v38_v18  ;;  %v236_v49 = vmul.f32 %v231_v43, %v38_v18  ;;  %v273_v56 = vmul.f32 %v268_v50, %v38_v18 }
  0xb2   :  { %v90_v29 = vsel %vm27_vm0, %v88_v25, 0.0  ;;  %v52_v30 = vsel %vm27_vm0, %v50_v26, 0.0  ;;  %v49_v32 = vrot.slane %v39_v24, %v44_v15  ;;  %v87_v33 = vrot.slane %v39_v24, %v82_v14 }
  0xb3   :  { %91 = vadd.xlane.f32.xlu0 %v90_v29  ;;  %53 = vadd.xlane.f32.xlu1 %v52_v30  ;;  %v127_v38 = vsel %vm27_vm0, %v125_v31, 0.0  ;;  %v124_v41 = vrot.slane %v39_v24, %v119_v16  ;;  %v164_v45 = vsel %vm27_vm0, %v162_v35, 0.0  ;;  %v161_v48 = vrot.slane %v39_v24, %v156_v19 }
  0xb4   :  { %v51_v34 = vmul.f32 %v49_v32, %v39_v24  ;;  %v89_v40 = vmul.f32 %v87_v33, %v39_v24  ;;  %v201_v52 = vsel %vm27_vm0, %v199_v42, 0.0  ;;  %v198_v55 = vrot.slane %v39_v24, %v193_v28 }
  0xb5   :  { %v126_v47 = vmul.f32 %v124_v41, %v39_v24  ;;  %v163_v54 = vmul.f32 %v161_v48, %v39_v24  ;;  %v238_v58 = vsel %vm27_vm0, %v236_v49, 0.0  ;;  %v235_v61 = vrot.slane %v39_v24, %v230_v37 }
  0xb6   :  { %v55_v39 = vsel %vm27_vm0, %v51_v34, 0.0  ;;  %v93_v46 = vsel %vm27_vm0, %v89_v40, 0.0  ;;  %v200_v60 = vmul.f32 %v198_v55, %v39_v24  ;;  %v275_v62 = vsel %vm27_vm0, %v273_v56, 0.0 }
  0xb7   :  { %128 = vadd.xlane.f32.xlu0 %v127_v38  ;;  %56 = vadd.xlane.f32.xlu1 %v55_v39  ;;  %v130_v53 = vsel %vm27_vm0, %v126_v47, 0.0  ;;  %v167_v59 = vsel %vm27_vm0, %v163_v54, 0.0  ;;  %v310_v0 = vmul.f32 %v305_v57, %v38_v18  ;;  %v237_v1 = vmul.f32 %v235_v61, %v39_v24 }
  0xb8   :  { %v204_v63 = vsel %vm27_vm0, %v200_v60, 0.0  ;;  %v272_v2 = vrot.slane %v39_v24, %v267_v44  ;;  %v309_v6 = vrot.slane %v39_v24, %v304_v51 }
  0xb9   :  { %v312_v3 = vsel %vm27_vm0, %v310_v0, 0.0  ;;  %v241_v4 = vsel %vm27_vm0, %v237_v1, 0.0 }
  0xba   :  { %v274_v5 = vmul.f32 %v272_v2, %v39_v24  ;;  %v311_v10 = vmul.f32 %v309_v6, %v39_v24 }
  0xbb   :  { %165 = vadd.xlane.f32.xlu0 %v164_v45  ;;  %94 = vadd.xlane.f32.xlu1 %v93_v46 }
  0xbc   :  { %v278_v8 = vsel %vm27_vm0, %v274_v5, 0.0  ;;  %v315_v11 = vsel %vm27_vm0, %v311_v10, 0.0 }
  0xbf   :  { %202 = vadd.xlane.f32.xlu0 %v201_v52  ;;  %131 = vadd.xlane.f32.xlu1 %v130_v53 }
  0xc3   :  { %239 = vadd.xlane.f32.xlu0 %v238_v58  ;;  %168 = vadd.xlane.f32.xlu1 %v167_v59 }
  0xc7   :  { %276 = vadd.xlane.f32.xlu0 %v275_v62  ;;  %205 = vadd.xlane.f32.xlu1 %v204_v63 }
  0xcb   :  { %313 = vadd.xlane.f32.xlu0 %v312_v3  ;;  %242 = vadd.xlane.f32.xlu1 %v241_v4 }
  0xcf   :  { %279 = vadd.xlane.f32.xlu1 %v278_v8 }
  0xd3   :  { %316 = vadd.xlane.f32.xlu1 %v315_v11 }
 0x13c   :  { %v54_v12 = vpop.xlane.xlu1 %53  ;;  %v92_v13 = vpop.xlane.xlu0 %91 }
 0x13d   :  { %v525_v16 = vmul.f32 10.0, %v54_v12  ;;  %v96_v17 = vmul.f32 10.0, %v92_v13 }
 0x13f   :  { %v61_v22 = vmul.f32 1.442695, %v525_v16  ;;  %v99_v23 = vmul.f32 1.442695, %v96_v17 }
 0x140   :  { %v57_v14 = vpop.xlane.xlu1 %56  ;;  %v129_v15 = vpop.xlane.xlu0 %128 }
 0x141   :  { %v527_v21 = vmul.f32 10.0, %v57_v14  ;;  %v133_v24 = vmul.f32 10.0, %v129_v15  ;;  %395 = vpow2.f32 %v61_v22 }
 0x142   :  { %397 = vpow2.f32 %v99_v23 }
 0x143   :  { %v63_v29 = vmul.f32 1.442695, %v527_v21  ;;  %v136_v32 = vmul.f32 1.442695, %v133_v24 }
 0x144   :  { %v95_v18 = vpop.xlane.xlu1 %94  ;;  %v166_v19 = vpop.xlane.xlu0 %165 }
 0x145   :  { %v97_v20 = vmul.f32 10.0, %v95_v18  ;;  %v170_v30 = vmul.f32 10.0, %v166_v19 }
 0x147   :  { %v101_v27 = vmul.f32 1.442695, %v97_v20  ;;  %v173_v37 = vmul.f32 1.442695, %v170_v30 }
 0x148   :  { %v132_v25 = vpop.xlane.xlu1 %131  ;;  %v203_v26 = vpop.xlane.xlu0 %202 }
 0x149   :  { %v134_v28 = vmul.f32 10.0, %v132_v25  ;;  %v207_v33 = vmul.f32 10.0, %v203_v26  ;;  %399 = vpow2.f32 %v101_v27 }
 0x14a   :  { %401 = vpow2.f32 %v63_v29 }
 0x14b   :  { %v138_v31 = vmul.f32 1.442695, %v134_v28  ;;  %v210_v40 = vmul.f32 1.442695, %v207_v33 }
 0x14c   :  { %v169_v34 = vpop.xlane.xlu1 %168  ;;  %v240_v35 = vpop.xlane.xlu0 %239 }
 0x14d   :  { %v171_v36 = vmul.f32 10.0, %v169_v34  ;;  %403 = vpow2.f32 %v138_v31  ;;  %v244_v39 = vmul.f32 10.0, %v240_v35 }
 0x14e   :  { %405 = vpow2.f32 %v136_v32  ;;  %v396_v53 = vpop.eup %395 }
 0x14f   :  { %v175_v38 = vmul.f32 1.442695, %v171_v36  ;;  %v247_v44 = vmul.f32 1.442695, %v244_v39  ;;  %v398_v55 = vpop.eup %397  ;;  %v70_v10 = vrot.slane %v396_v53, %v499_v9 }
 0x150   :  { %v206_v41 = vpop.xlane.xlu1 %205  ;;  %v277_v42 = vpop.xlane.xlu0 %276  ;;  %v108_v3 = vrot.slane %v398_v55, %v499_v9  ;;  %v350_v55 = vrot.slane %v527_v21, %v499_v9 }
 0x151   :  { %407 = vpow2.f32 %v175_v38  ;;  %v208_v43 = vmul.f32 10.0, %v206_v41  ;;  %v281_v46 = vmul.f32 10.0, %v277_v42 }
 0x152   :  { %409 = vpow2.f32 %v173_v37 }
 0x153   :  { %v212_v45 = vmul.f32 1.442695, %v208_v43  ;;  %411 = vpow2.f32 %v210_v40  ;;  %v284_v50 = vmul.f32 1.442695, %v281_v46 }
 0x154   :  { %v243_v47 = vpop.xlane.xlu1 %242  ;;  %v314_v48 = vpop.xlane.xlu0 %313 }
 0x155   :  { %413 = vpow2.f32 %v212_v45  ;;  %v245_v49 = vmul.f32 10.0, %v243_v47  ;;  %v318_v52 = vmul.f32 10.0, %v314_v48 }
 0x156   :  { %415 = vpow2.f32 %v247_v44  ;;  %v400_v57 = vpop.eup %399 }
 0x157   :  { %v249_v51 = vmul.f32 1.442695, %v245_v49  ;;  %v402_v58 = vpop.eup %401  ;;  %v321_v59 = vmul.f32 1.442695, %v318_v52  ;;  %v112_v0 = vrot.slane %v400_v57, %v499_v9  ;;  %v346_v57 = vrot.slane %v525_v16, %v499_v9 }
 0x158   :  { %v280_v54 = vpop.xlane.xlu1 %279  ;;  %v74_v4 = vrot.slane %v402_v58, %v499_v9 }
 0x159   :  { %417 = vpow2.f32 %v249_v51  ;;  %v282_v56 = vmul.f32 10.0, %v280_v54  ;;  %v113_v13 = vsel %vm75_vm1, %v112_v0, %v108_v3 }
 0x15a   :  { %419 = vpow2.f32 %v284_v50  ;;  %v404_v61 = vpop.eup %403  ;;  %v76_v17 = vsel %vm75_vm1, %v74_v4, %v70_v10  ;;  %v115_v23 = vsel %vm98_vm2, 0.0, %v113_v13 }
 0x15b   :  { %v286_v60 = vmul.f32 1.442695, %v282_v56  ;;  %v406_v63 = vpop.eup %405  ;;  %v149_v5 = vrot.slane %v404_v61, %v499_v9  ;;  %v78_v27 = vsel %vm60_vm3, 0.0, %v76_v17 }
 0x15c   :  { %v317_v62 = vpop.xlane.xlu1 %316  ;;  %v145_v12 = vrot.slane %v406_v63, %v499_v9  ;;  %v116_v29 = vadd.f32 %v115_v23, %v78_v27 }
 0x15d   :  { %421 = vpow2.f32 %v286_v60  ;;  %v319_v1 = vmul.f32 10.0, %v317_v62 }
 0x15e   :  { %v408_v2 = vpop.eup %407  ;;  %423 = vpow2.f32 %v321_v59  ;;  %v150_v19 = vsel %vm75_vm1, %v149_v5, %v145_v12  ;;  %v351_v59 = vsel %vm75_vm1, %v350_v55, %v346_v57 }
 0x15f   :  { %v323_v6 = vmul.f32 1.442695, %v319_v1  ;;  %v410_v8 = vpop.eup %409  ;;  %v186_v14 = vrot.slane %v408_v2, %v499_v9  ;;  %v152_v28 = vsel %vm135_vm4, 0.0, %v150_v19 }
 0x160   :  { %v412_v11 = vpop.eup %411  ;;  %v182_v18 = vrot.slane %v410_v8, %v499_v9  ;;  %v153_v35 = vadd.f32 %v152_v28, %v116_v29 }
 0x161   :  { %425 = vpow2.f32 %v323_v6  ;;  %v219_v24 = vrot.slane %v412_v11, %v499_v9 }
 0x162   :  { %v414_v15 = vpop.eup %413  ;;  %v187_v25 = vsel %vm75_vm1, %v186_v14, %v182_v18 }
 0x163   :  { %v223_v20 = vrot.slane %v414_v15, %v499_v9  ;;  %v416_v22 = vpop.eup %415  ;;  %v189_v34 = vsel %vm172_vm5, 0.0, %v187_v25 }
 0x164   :  { %v256_v30 = vrot.slane %v416_v22, %v499_v9  ;;  %v190_v41 = vadd.f32 %v189_v34, %v153_v35 }
 0x165   :  { %v224_v32 = vsel %vm75_vm1, %v223_v20, %v219_v24 }
 0x166   :  { %v418_v26 = vpop.eup %417  ;;  %v226_v38 = vsel %vm209_vm6, 0.0, %v224_v32 }
 0x167   :  { %v260_v31 = vrot.slane %v418_v26, %v499_v9  ;;  %v420_v33 = vpop.eup %419  ;;  %v227_v44 = vadd.f32 %v226_v38, %v190_v41 }
 0x168   :  { %v293_v39 = vrot.slane %v420_v33, %v499_v9 }
 0x169   :  { %v261_v36 = vsel %vm75_vm1, %v260_v31, %v256_v30 }
 0x16a   :  { %v422_v37 = vpop.eup %421  ;;  %v263_v43 = vsel %vm246_vm7, 0.0, %v261_v36 }
 0x16b   :  { %v297_v40 = vrot.slane %v422_v37, %v499_v9  ;;  %v424_v42 = vpop.eup %423  ;;  %v264_v50 = vadd.f32 %v263_v43, %v227_v44 }
 0x16c   :  { %v330_v48 = vrot.slane %v424_v42, %v499_v9 }
 0x16d   :  { %v298_v45 = vsel %vm75_vm1, %v297_v40, %v293_v39 }
 0x16e   :  { %v426_v46 = vpop.eup %425  ;;  %v300_v47 = vsel %vm283_vm8, 0.0, %v298_v45 }
 0x16f   :  { %v334_v49 = vrot.slane %v426_v46, %v499_v9  ;;  %v301_v51 = vadd.f32 %v300_v47, %v264_v50 }
 0x171   :  { %v335_v52 = vsel %vm75_vm1, %v334_v49, %v330_v48 }
 0x172   :  { %v337_v53 = vsel %vm320_vm9, 0.0, %v335_v52 }
 0x173   :  { %v338_v54 = vadd.f32 %v337_v53, %v301_v51 }
 0x175   :  { %427 = vlog2.f32 %v338_v54 }
 0x182   :  { %v428_v56 = vpop.eup %427 }
 0x183   :  { %v340_v58 = vmul.f32 0.6931472, %v428_v56 }
 0x185   :  { %v353_v60 = vsub.f32 %v340_v58, %v351_v59 }
 0x187   :  { %v354_v61 = vmul.f32 0.07341405, %v353_v60 }
 0x189   :  { %356 = vrot.lane.b32.xlu0 %v354_v61, %s476_s0 }
 0x1fb   :  { %v357_v7 = vpop.permute.xlu0 %356 }
 0x1fc   :  { %v360_v62 = vsel %vm359_vm10, %v357_v7, 0.0 }
 0x1fd   :  { %361 = vadd.xlane.f32.xlu1 %v360_v62 }
 0x286   :  { %v362_v63 = vpop.xlane.xlu1 %361 }
 0x287   :  { %v367_v21 = vrot.slane %v362_v63, %v499_v9 }
 0x289   :  { %370 = vst.msk [vmem:[#allocation5] sm:$0x1] %vm369_vm11, %v367_v21 }
 0x28a   :  { %460 = shalt.err (!%p457_p9)
}
 0x28b   :  { %380 = dma.vmem_to_hbm [thread:$0]  %s378_s14, 16, %s573_s1, [#allocation4]  }
 0x28c   :  { %471 = dma.done.wait [#allocation4], 16  }
 0x28d   :  { %472 = vsyncadd [#allocation4], 4294967280 }
 0x28e   :  { %384 = vsyncpa [#allocation3], 1 }
 0x28f   :  { %385 = vsyncpa [#allocation4], 1 }

</bundles_post_ra>
